<compile_context>
chip_gen: v7x
topology: tpu7x:2x2x1
jax: 0.10.0
libtpu: 0.0.40
codegen_flags: <defaults>
</compile_context>

<pallas_src>
import functools

import jax
import jax.numpy as jnp
from jax.experimental import pallas as pl
from jax.experimental.pallas import tpu as pltpu


def _round_up(x, m):
    return ((x + m - 1) // m) * m


def _device_vmem_capacity_bytes():
    """Physical per-TensorCore VMEM (128 MiB on v5e/v6e, 64 MiB on v7x)."""
    try:
        cap = int(pltpu.get_tpu_info().vmem_capacity_bytes)
        if cap > 0:
            return cap
    except Exception:  # pragma: no cover - interpret mode / older jax
        pass
    return 64 * 1024 * 1024  # conservative: v7x per-core VMEM


# ----------------------------- kernel bodies ---------------------------------


def _k1_kernel(x_ref, w_ref, b_ref, o_ref, *, compute_dtype):
    """kernel_size == 1: a single MXU matmul."""
    x = x_ref[0].astype(compute_dtype)                      # (C_in, TT)
    acc = jnp.dot(w_ref[...], x, preferred_element_type=jnp.float32)
    o_ref[0] = (acc + b_ref[...]).astype(o_ref.dtype)


def _im2col_kernel(x_ref, h_ref, w_ref, b_ref, o_ref, *, kernel_size, dilation,
                   halo, compute_dtype):
    """Small C_in: fold all K taps into one wide-contraction matmul so the MXU
    contraction dim is K*C_in instead of a tiny C_in."""
    tt = o_ref.shape[-1]
    x = x_ref[0].astype(compute_dtype)                                  # (C_in, TT)
    xw = jnp.concatenate(
        [x, h_ref[0][:, :halo].astype(compute_dtype)], axis=-1)        # (C_in, TT+halo)
    slab = jnp.concatenate(
        [xw[:, k * dilation:k * dilation + tt] for k in range(kernel_size)],
        axis=0)                                                         # (K*C_in, TT)
    acc = jnp.dot(w_ref[...], slab, preferred_element_type=jnp.float32)
    o_ref[0] = (acc + b_ref[...]).astype(o_ref.dtype)


def _taps_kernel(x_ref, h_ref, w_ref, b_ref, o_ref, acc_ref, *, kernel_size,
                 dilation, compute_dtype):
    """Large C_in: per-tap matmul accumulation into a f32 scratch accumulator.

    No im2col slab and no full-tile halo stitch: tap k's main contribution is
    dot(w_k, x[:, k*d:]) into acc[:, :TT-k*d]; the trailing k*d output columns
    (which read the next tile's halo) get one small extra dot.
    """
    tt = o_ref.shape[-1]
    c_in = x_ref.shape[1]
    x = x_ref[0].astype(compute_dtype)                       # (C_in, TT)
    h = h_ref[0].astype(compute_dtype)                       # (C_in, HB)
    # Tap 0 initializes the accumulator (no separate zero-fill pass).
    acc_ref[...] = jnp.dot(w_ref[:, pl.ds(0, c_in)], x,
                           preferred_element_type=jnp.float32)
    for k in range(1, kernel_size):
        off = k * dilation
        w_k = w_ref[:, pl.ds(k * c_in, c_in)]
        acc_ref[:, pl.ds(0, tt - off)] += jnp.dot(
            w_k, x[:, off:], preferred_element_type=jnp.float32)
        acc_ref[:, pl.ds(tt - off, off)] += jnp.dot(
            w_k, h[:, :off], preferred_element_type=jnp.float32)
    o_ref[0] = (acc_ref[...] + b_ref[...]).astype(o_ref.dtype)


# ----------------------------- tiling helpers --------------------------------


def _vmem_bytes(tt, hb, c_in, c_out_t, kc, x_bytes, cd_bytes, out_bytes,
                use_taps):
    dma = 2 * c_in * (tt + hb) * x_bytes            # x tile + halo (double-buffered)
    dma += 2 * c_out_t * tt * out_bytes             # output tile (double-buffered)
    dma += c_out_t * kc * cd_bytes + c_out_t * 4    # weights + bias (single-buffered)
    tmp = c_out_t * tt * 4                          # f32 accumulator
    tmp += c_in * (tt + hb) * cd_bytes              # loaded / stitched input values
    if not use_taps:
        tmp += kc * tt * cd_bytes                   # im2col slab
    return dma + tmp


def _pick_time_tile(requested, t_out, base, hb, c_in, c_out_t, kc, x_bytes,
                    cd_bytes, out_bytes, use_taps, budget):
    cap = max(base, _round_up(t_out, base))         # never bigger than the problem
    tt = min(max(base, _round_up(requested, base)), cap)
    while tt > base and _vmem_bytes(tt, hb, c_in, c_out_t, kc, x_bytes,
                                    cd_bytes, out_bytes, use_taps) > budget:
        tt -= base
    return tt


# --------------------------------- wrapper -----------------------------------


def conv_norm_forward(x_ncl, weight_oik, bias_o=None, *, kernel_size, stride=1,
                      padding=None, dilation=1, compute_dtype=jnp.bfloat16,
                      time_tile=1024, cout_tile=512, taps_min_cin=128,
                      vmem_budget_bytes=None):
    """ConvNorm.forward.

    x_ncl: (B, C_in, T); weight_oik: (C_out, C_in, K); bias_o: (C_out,) or None.
    Returns (B, C_out, T_out) exactly like torch.nn.Conv1d (stride=1).
    Note: compute_dtype=bfloat16 (default) quantizes matmul operands with f32
    accumulation; use compute_dtype=jnp.float32 for exact Conv1d parity.
    """
    if stride != 1:
        raise NotImplementedError("TODO(synk): only stride=1 is implemented.")
    B, C_in, T = x_ncl.shape
    C_out, c_in_w, K = weight_oik.shape
    assert c_in_w == C_in and K == kernel_size
    if padding is None:
        assert kernel_size % 2 == 1
        padding = int(dilation * (kernel_size - 1) / 2)

    halo = dilation * (kernel_size - 1)
    T_out = T + 2 * padding - halo
    assert T_out >= 1

    in_dtype = x_ncl.dtype
    in_bytes = jnp.dtype(in_dtype).itemsize
    cd_bytes = jnp.dtype(compute_dtype).itemsize
    out_bytes = in_bytes
    x_dma_bytes = min(in_bytes, cd_bytes)           # downcast is folded into pad
    KC = K * C_in
    use_taps = (K > 1) and (C_in >= taps_min_cin)

    # ---- C_out tiling (keeps the weight block bounded for large channels) ----
    if cout_tile is None:
        cout_tile = 512
    if C_out <= cout_tile:
        CT = C_out
    else:
        CT = max(8, (min(cout_tile, C_out) // 8) * 8)
    C_out_pad = _round_up(C_out, CT)
    n_co = C_out_pad // CT

    # ---- VMEM-capacity-aware budget / limit (v7x only has 64 MiB / core) ----
    vmem_cap = _device_vmem_capacity_bytes()
    if vmem_budget_bytes is None:
        # ~3/8 of physical VMEM: 48 MiB on v5e/v6e, 24 MiB on v7x.
        vmem_budget_bytes = (vmem_cap * 3) // 8
    vmem_budget_bytes = min(vmem_budget_bytes, (vmem_cap * 5) // 8)

    # ---- time tiling (128-aligned halo so plain Blocked specs reach it) -----
    HB = _round_up(halo, 128) if halo > 0 else 0
    base = max(128, HB)
    TT = _pick_time_tile(time_tile, T_out, base, HB, C_in, CT, KC,
                         x_dma_bytes, cd_bytes, out_bytes, use_taps,
                         vmem_budget_bytes)
    # v7x has two TensorCores: give single-batch short inputs >= 2 grid steps.
    if B * n_co == 1:
        while TT > base and pl.cdiv(T_out, TT) < 2:
            TT -= base
    nT = pl.cdiv(T_out, TT)
    T_out_pad = nT * TT
    L = T_out_pad + HB                              # padded input time length

    # Pad once and fold the compute-dtype downcast into the same pass so the
    # kernel's input DMA (and x double buffers) use the narrow dtype.
    x_pad = jnp.pad(x_ncl, ((0, 0), (0, 0), (padding, L - padding - T)))
    if cd_bytes < in_bytes:
        x_pad = x_pad.astype(compute_dtype)

    # (C_out, K*C_in): slab/tap column k*C_in + c matches weight[:, c, k].
    w2d = jnp.transpose(weight_oik, (0, 2, 1)).reshape(C_out, KC)
    w2d = w2d.astype(compute_dtype)
    if bias_o is None:
        b2d = jnp.zeros((C_out, 1), jnp.float32)
    else:
        b2d = bias_o.reshape(C_out, 1).astype(jnp.float32)
    if C_out_pad != C_out:
        w2d = jnp.pad(w2d, ((0, C_out_pad - C_out), (0, 0)))
        b2d = jnp.pad(b2d, ((0, C_out_pad - C_out), (0, 0)))

    # ---- kernel selection ----------------------------------------------------
    if K == 1:
        kernel = functools.partial(_k1_kernel, compute_dtype=compute_dtype)
        scratch = ()
    elif use_taps:
        kernel = functools.partial(_taps_kernel, kernel_size=K,
                                   dilation=dilation, compute_dtype=compute_dtype)
        scratch = (pltpu.VMEM((CT, TT), jnp.float32),)
    else:
        kernel = functools.partial(_im2col_kernel, kernel_size=K,
                                   dilation=dilation, halo=halo,
                                   compute_dtype=compute_dtype)
        scratch = ()

    est = _vmem_bytes(TT, HB, C_in, CT, KC, x_dma_bytes, cd_bytes, out_bytes,
                      use_taps)
    vmem_limit = int(min(max(32 << 20, 1.4 * est + (2 << 20)),
                         vmem_cap - (8 << 20)))

    cost = pl.CostEstimate(
        flops=int(2 * B * K * C_in * C_out * T_out),
        bytes_accessed=int(B * C_in * T * x_dma_bytes + C_out * KC * cd_bytes
                           + B * C_out * T_out * out_bytes),
        transcendentals=0)

    use_single_buffer_consts = (n_co == 1) and hasattr(pl, "Buffered")

    def _launch(single_buffer_consts):
        # Weights/bias have a constant index map when n_co == 1: single-buffer
        # them so their VMEM residency is halved.
        const_kw = (dict(pipeline_mode=pl.Buffered(1))
                    if single_buffer_consts else {})
        x_spec = pl.BlockSpec((1, C_in, TT), lambda b, co, j: (b, 0, j))
        w_spec = pl.BlockSpec((CT, KC), lambda b, co, j: (co, 0), **const_kw)
        b_spec = pl.BlockSpec((CT, 1), lambda b, co, j: (co, 0), **const_kw)
        out_spec = pl.BlockSpec((1, CT, TT), lambda b, co, j: (b, co, j))
        if K > 1:
            tt_per_hb = TT // HB
            h_spec = pl.BlockSpec(
                (1, C_in, HB), lambda b, co, j: (b, 0, (j + 1) * tt_per_hb))
            in_specs = [x_spec, h_spec, w_spec, b_spec]
            operands = (x_pad, x_pad, w2d, b2d)
        else:
            in_specs = [x_spec, w_spec, b_spec]
            operands = (x_pad, w2d, b2d)
        return pl.pallas_call(
            kernel,
            out_shape=jax.ShapeDtypeStruct((B, C_out_pad, T_out_pad), in_dtype),
            grid=(B, n_co, nT),
            in_specs=in_specs,
            out_specs=out_spec,
            scratch_shapes=scratch,
            compiler_params=pltpu.CompilerParams(
                dimension_semantics=("parallel", "parallel", "parallel"),
                vmem_limit_bytes=vmem_limit),
            cost_estimate=cost,
        )(*operands)

    if use_single_buffer_consts:
        try:
            out_full = _launch(True)
        except Exception:  # pragma: no cover - pipeline_mode not supported
            out_full = _launch(False)
    else:
        out_full = _launch(False)

    if C_out_pad != C_out or T_out_pad != T_out:
        out_full = out_full[:, :C_out, :T_out]
    return out_full


if __name__ == "__main__":
    import numpy as np

    def ref_conv1d(x, w, b, *, dilation, padding):
        x = np.asarray(x, np.float64)
        w = np.asarray(w, np.float64)
        b = np.zeros((w.shape[0],)) if b is None else np.asarray(b, np.float64)
        B, C_in, T = x.shape
        C_out, _, K = w.shape
        xp = np.pad(x, ((0, 0), (0, 0), (padding, padding)))
        T_out = T + 2 * padding - dilation * (K - 1)
        out = np.zeros((B, C_out, T_out))
        for k in range(K):
            out += np.einsum("oi,bit->bot", w[:, :, k],
                             xp[:, :, k * dilation:k * dilation + T_out])
        return out + b[None, :, None]

    key = jax.random.PRNGKey(0)
    kx, kw, kb, kx2, kw2, kx3, kw3, kb3 = jax.random.split(key, 8)

    # Small shapes consistent with ConvNorm(in_channels=4, out_channels=8,
    # kernel_size=3) applied to a (B=2, C_in=4, T=16) input.
    B, C_in, C_out, T, K, DIL = 2, 4, 8, 16, 3, 1
    bound = 1.0 / (C_in * K) ** 0.5
    x = jax.random.normal(kx, (B, C_in, T), dtype=jnp.float32)
    w = jax.random.uniform(kw, (C_out, C_in, K), jnp.float32, -bound, bound)
    b = jax.random.uniform(kb, (C_out,), jnp.float32, -bound, bound)
    ref = ref_conv1d(x, w, b, dilation=DIL, padding=DIL * (K - 1) // 2)

    # 1) f32-compute path (im2col branch): tight numerical check.
    out_f32 = jax.block_until_ready(
        conv_norm_forward(x, w, b, kernel_size=K, dilation=DIL,
                          compute_dtype=jnp.float32))
    assert out_f32.shape == (B, C_out, T), out_f32.shape
    assert np.allclose(np.asarray(out_f32), ref, atol=1e-4, rtol=1e-4)

    # 2) default bf16-operand / f32-accumulate path: loose numerical check.
    out_bf16 = jax.block_until_ready(
        conv_norm_forward(x, w, b, kernel_size=K, dilation=DIL))
    assert np.allclose(np.asarray(out_bf16), ref, atol=1e-1, rtol=1e-1)

    # 3) kernel_size=1 (the ConvNorm default) -> single-matmul path.
    w1 = jax.random.uniform(kw2, (C_out, C_in, 1), jnp.float32, -0.5, 0.5)
    out_k1 = jax.block_until_ready(
        conv_norm_forward(x, w1, b, kernel_size=1, compute_dtype=jnp.float32))
    ref_k1 = ref_conv1d(x, w1, b, dilation=1, padding=0)
    assert out_k1.shape == (B, C_out, T)
    assert np.allclose(np.asarray(out_k1), ref_k1, atol=1e-4, rtol=1e-4)

    # 4) multi-tile + dilation (im2col branch): cross-tile halo stitching.
    T2, K2, DIL2 = 300, 5, 2
    bound2 = 1.0 / (C_in * K2) ** 0.5
    x2 = jax.random.normal(kx2, (B, C_in, T2), dtype=jnp.float32)
    w2 = jax.random.uniform(kw, (C_out, C_in, K2), jnp.float32, -bound2, bound2)
    out_mt = jax.block_until_ready(
        conv_norm_forward(x2, w2, b, kernel_size=K2, dilation=DIL2,
                          compute_dtype=jnp.float32, time_tile=128))
    ref_mt = ref_conv1d(x2, w2, b, dilation=DIL2, padding=DIL2 * (K2 - 1) // 2)
    assert out_mt.shape == ref_mt.shape, (out_mt.shape, ref_mt.shape)
    assert np.allclose(np.asarray(out_mt), ref_mt, atol=1e-4, rtol=1e-4)

    # 5) large-C_in per-tap-accumulation branch + C_out tiling (n_co=2) +
    #    multi-tile halo + dilation.
    CB_in, CB_out, T3, K3, DIL3 = 128, 16, 200, 3, 2
    bound3 = 1.0 / (CB_in * K3) ** 0.5
    x3 = jax.random.normal(kx3, (B, CB_in, T3), dtype=jnp.float32)
    w3 = jax.random.uniform(kw3, (CB_out, CB_in, K3), jnp.float32, -bound3, bound3)
    b3 = jax.random.uniform(kb3, (CB_out,), jnp.float32, -bound3, bound3)
    out_tp = jax.block_until_ready(
        conv_norm_forward(x3, w3, b3, kernel_size=K3, dilation=DIL3,
                          compute_dtype=jnp.float32, time_tile=128,
                          cout_tile=8))
    ref_tp = ref_conv1d(x3, w3, b3, dilation=DIL3, padding=DIL3 * (K3 - 1) // 2)
    assert out_tp.shape == ref_tp.shape, (out_tp.shape, ref_tp.shape)
    assert np.allclose(np.asarray(out_tp), ref_tp, atol=5e-4, rtol=5e-4)

    print("KERNEL_OK")
</pallas_src>

<mosaic_0001>
module attributes {stable_mosaic.version = 11 : i64} {
  func.func @_im2col_kernel(%arg0: i32, %arg1: i32, %arg2: i32, %arg3: memref<1x4x128xf32, #tpu.memory_space<vmem>>, %arg4: memref<1x4x128xf32, #tpu.memory_space<vmem>>, %arg5: memref<8x12xf32, #tpu.memory_space<vmem>>, %arg6: memref<8x1xf32, #tpu.memory_space<vmem>>, %arg7: memref<1x8x128xf32, #tpu.memory_space<vmem>>) attributes {dimension_semantics = [#tpu.dimension_semantics<parallel>, #tpu.dimension_semantics<parallel>, #tpu.dimension_semantics<parallel>], iteration_bounds = array<i64: 2, 1, 1>, scalar_prefetch = 0 : i64, scratch_operands = 0 : i64, tpu.core_type = #tpu.core_type<tc>, window_params = [{transform_indices = @transform_0, window_bounds = array<i64: 1, 4, 128>}, {transform_indices = @transform_1, window_bounds = array<i64: 1, 4, 128>}, {pipeline_mode = #tpu.pipeline_mode<synchronous>, transform_indices = @transform_2, window_bounds = array<i64: 8, 12>}, {pipeline_mode = #tpu.pipeline_mode<synchronous>, transform_indices = @transform_3, window_bounds = array<i64: 8, 1>}, {transform_indices = @transform_4, window_bounds = array<i64: 1, 8, 128>}]} {
    %c0 = arith.constant 0 : index
    %c0_0 = arith.constant 0 : index
    %c0_1 = arith.constant 0 : index
    %0 = vector.load %arg3[%c0, %c0_0, %c0_1] : memref<1x4x128xf32, #tpu.memory_space<vmem>>, vector<1x4x128xf32>
    %1 = vector.shape_cast %0 : vector<1x4x128xf32> to vector<4x128xf32>
    %c0_2 = arith.constant 0 : index
    %c0_3 = arith.constant 0 : index
    %c0_4 = arith.constant 0 : index
    %2 = vector.load %arg4[%c0_2, %c0_3, %c0_4] : memref<1x4x128xf32, #tpu.memory_space<vmem>>, vector<1x4x128xf32>
    %3 = vector.shape_cast %2 : vector<1x4x128xf32> to vector<4x128xf32>
    %4 = vector.extract_strided_slice %3 {offsets = [0, 0], sizes = [4, 2], strides = [1, 1]} : vector<4x128xf32> to vector<4x2xf32>
    %5 = tpu.concatenate %1, %4 in 1 : vector<4x128xf32>, vector<4x2xf32> -> vector<4x130xf32>
    %6 = vector.extract_strided_slice %5 {offsets = [0, 0], sizes = [4, 128], strides = [1, 1]} : vector<4x130xf32> to vector<4x128xf32>
    %7 = vector.extract_strided_slice %5 {offsets = [0, 1], sizes = [4, 128], strides = [1, 1]} : vector<4x130xf32> to vector<4x128xf32>
    %8 = vector.extract_strided_slice %5 {offsets = [0, 2], sizes = [4, 128], strides = [1, 1]} : vector<4x130xf32> to vector<4x128xf32>
    %9 = tpu.concatenate %6, %7, %8 in 0 : vector<4x128xf32>, vector<4x128xf32>, vector<4x128xf32> -> vector<12x128xf32>
    %c0_5 = arith.constant 0 : index
    %c0_6 = arith.constant 0 : index
    %10 = vector.load %arg5[%c0_5, %c0_6] : memref<8x12xf32, #tpu.memory_space<vmem>>, vector<8x12xf32>
    %cst = arith.constant dense<0.000000e+00> : vector<8x128xf32>
    %11 = tpu.matmul %10, %9, %cst {dimension_numbers = #tpu.dot_dimension_numbers<[1], [0], [0], [1], [0, 0, 1, 1], [], []>} : vector<8x12xf32>, vector<12x128xf32>, vector<8x128xf32> -> vector<8x128xf32>
    %c0_7 = arith.constant 0 : index
    %c0_8 = arith.constant 0 : index
    %12 = vector.load %arg6[%c0_7, %c0_8] : memref<8x1xf32, #tpu.memory_space<vmem>>, vector<8x1xf32>
    %13 = vector.broadcast %12 : vector<8x1xf32> to vector<8x128xf32>
    %14 = arith.addf %11, %13 : vector<8x128xf32>
    %c0_9 = arith.constant 0 : index
    %c0_10 = arith.constant 0 : index
    %c0_11 = arith.constant 0 : index
    %15 = vector.load %arg7[%c0_9, %c0_10, %c0_11] : memref<1x8x128xf32, #tpu.memory_space<vmem>>, vector<1x8x128xf32>
    %16 = vector.shape_cast %15 : vector<1x8x128xf32> to vector<8x128xf32>
    %17 = vector.shape_cast %14 : vector<8x128xf32> to vector<1x8x128xf32>
    tpu.vector_store %arg7[%c0_9, %c0_10, %c0_11], %17 {strides = array<i32>} : memref<1x8x128xf32, #tpu.memory_space<vmem>>, vector<1x8x128xf32>,
    return
  }
  func.func @transform_0(%arg0: i32, %arg1: i32, %arg2: i32) -> (i32, i32, i32) {
    %c0_i32 = arith.constant 0 : i32
    %c0_i32_0 = arith.constant 0 : i32
    return %arg0, %c0_i32, %arg2 : i32, i32, i32
  }
  func.func @transform_1(%arg0: i32, %arg1: i32, %arg2: i32) -> (i32, i32, i32) {
    %c1_i32 = arith.constant 1 : i32
    %0 = arith.addi %arg2, %c1_i32 : i32
    %c1_i32_0 = arith.constant 1 : i32
    %1 = arith.muli %0, %c1_i32_0 : i32
    %c0_i32 = arith.constant 0 : i32
    %c0_i32_1 = arith.constant 0 : i32
    return %arg0, %c0_i32, %1 : i32, i32, i32
  }
  func.func @transform_2(%arg0: i32, %arg1: i32, %arg2: i32) -> (i32, i32) {
    %c0_i32 = arith.constant 0 : i32
    %c0_i32_0 = arith.constant 0 : i32
    return %arg1, %c0_i32 : i32, i32
  }
  func.func @transform_3(%arg0: i32, %arg1: i32, %arg2: i32) -> (i32, i32) {
    %c0_i32 = arith.constant 0 : i32
    %c0_i32_0 = arith.constant 0 : i32
    return %arg1, %c0_i32 : i32, i32
  }
  func.func @transform_4(%arg0: i32, %arg1: i32, %arg2: i32) -> (i32, i32, i32) {
    %c0_i32 = arith.constant 0 : i32
    return %arg0, %arg1, %arg2 : i32, i32, i32
  }
}

module attributes {stable_mosaic.version = 11 : i64} {
  func.func @_im2col_kernel(%arg0: i32, %arg1: i32, %arg2: i32, %arg3: memref<1x4x128xf32, #tpu.memory_space<vmem>>, %arg4: memref<1x4x128xf32, #tpu.memory_space<vmem>>, %arg5: memref<8x12xf32, #tpu.memory_space<vmem>>, %arg6: memref<8x1xf32, #tpu.memory_space<vmem>>, %arg7: memref<1x8x128xf32, #tpu.memory_space<vmem>>) attributes {dimension_semantics = [#tpu.dimension_semantics<parallel>, #tpu.dimension_semantics<parallel>, #tpu.dimension_semantics<parallel>], iteration_bounds = array<i64: 2, 1, 1>, scalar_prefetch = 0 : i64, scratch_operands = 0 : i64, tpu.core_type = #tpu.core_type<tc>, window_params = [{transform_indices = @transform_0, window_bounds = array<i64: 1, 4, 128>}, {transform_indices = @transform_1, window_bounds = array<i64: 1, 4, 128>}, {transform_indices = @transform_2, window_bounds = array<i64: 8, 12>}, {transform_indices = @transform_3, window_bounds = array<i64: 8, 1>}, {transform_indices = @transform_4, window_bounds = array<i64: 1, 8, 128>}]} {
    %c0 = arith.constant 0 : index
    %c0_0 = arith.constant 0 : index
    %c0_1 = arith.constant 0 : index
    %0 = vector.load %arg3[%c0, %c0_0, %c0_1] : memref<1x4x128xf32, #tpu.memory_space<vmem>>, vector<1x4x128xf32>
    %1 = vector.shape_cast %0 : vector<1x4x128xf32> to vector<4x128xf32>
    %c0_2 = arith.constant 0 : index
    %c0_3 = arith.constant 0 : index
    %c0_4 = arith.constant 0 : index
    %2 = vector.load %arg4[%c0_2, %c0_3, %c0_4] : memref<1x4x128xf32, #tpu.memory_space<vmem>>, vector<1x4x128xf32>
    %3 = vector.shape_cast %2 : vector<1x4x128xf32> to vector<4x128xf32>
    %4 = vector.extract_strided_slice %3 {offsets = [0, 0], sizes = [4, 2], strides = [1, 1]} : vector<4x128xf32> to vector<4x2xf32>
    %5 = tpu.concatenate %1, %4 in 1 : vector<4x128xf32>, vector<4x2xf32> -> vector<4x130xf32>
    %6 = vector.extract_strided_slice %5 {offsets = [0, 0], sizes = [4, 128], strides = [1, 1]} : vector<4x130xf32> to vector<4x128xf32>
    %7 = vector.extract_strided_slice %5 {offsets = [0, 1], sizes = [4, 128], strides = [1, 1]} : vector<4x130xf32> to vector<4x128xf32>
    %8 = vector.extract_strided_slice %5 {offsets = [0, 2], sizes = [4, 128], strides = [1, 1]} : vector<4x130xf32> to vector<4x128xf32>
    %9 = tpu.concatenate %6, %7, %8 in 0 : vector<4x128xf32>, vector<4x128xf32>, vector<4x128xf32> -> vector<12x128xf32>
    %c0_5 = arith.constant 0 : index
    %c0_6 = arith.constant 0 : index
    %10 = vector.load %arg5[%c0_5, %c0_6] : memref<8x12xf32, #tpu.memory_space<vmem>>, vector<8x12xf32>
    %cst = arith.constant dense<0.000000e+00> : vector<8x128xf32>
    %11 = tpu.matmul %10, %9, %cst {dimension_numbers = #tpu.dot_dimension_numbers<[1], [0], [0], [1], [0, 0, 1, 1], [], []>} : vector<8x12xf32>, vector<12x128xf32>, vector<8x128xf32> -> vector<8x128xf32>
    %c0_7 = arith.constant 0 : index
    %c0_8 = arith.constant 0 : index
    %12 = vector.load %arg6[%c0_7, %c0_8] : memref<8x1xf32, #tpu.memory_space<vmem>>, vector<8x1xf32>
    %13 = vector.broadcast %12 : vector<8x1xf32> to vector<8x128xf32>
    %14 = arith.addf %11, %13 : vector<8x128xf32>
    %c0_9 = arith.constant 0 : index
    %c0_10 = arith.constant 0 : index
    %c0_11 = arith.constant 0 : index
    %15 = vector.load %arg7[%c0_9, %c0_10, %c0_11] : memref<1x8x128xf32, #tpu.memory_space<vmem>>, vector<1x8x128xf32>
    %16 = vector.shape_cast %15 : vector<1x8x128xf32> to vector<8x128xf32>
    %17 = vector.shape_cast %14 : vector<8x128xf32> to vector<1x8x128xf32>
    tpu.vector_store %arg7[%c0_9, %c0_10, %c0_11], %17 {strides = array<i32>} : memref<1x8x128xf32, #tpu.memory_space<vmem>>, vector<1x8x128xf32>,
    return
  }
  func.func @transform_0(%arg0: i32, %arg1: i32, %arg2: i32) -> (i32, i32, i32) {
    %c0_i32 = arith.constant 0 : i32
    %c0_i32_0 = arith.constant 0 : i32
    return %arg0, %c0_i32, %arg2 : i32, i32, i32
  }
  func.func @transform_1(%arg0: i32, %arg1: i32, %arg2: i32) -> (i32, i32, i32) {
    %c1_i32 = arith.constant 1 : i32
    %0 = arith.addi %arg2, %c1_i32 : i32
    %c1_i32_0 = arith.constant 1 : i32
    %1 = arith.muli %0, %c1_i32_0 : i32
    %c0_i32 = arith.constant 0 : i32
    %c0_i32_1 = arith.constant 0 : i32
    return %arg0, %c0_i32, %1 : i32, i32, i32
  }
  func.func @transform_2(%arg0: i32, %arg1: i32, %arg2: i32) -> (i32, i32) {
    %c0_i32 = arith.constant 0 : i32
    %c0_i32_0 = arith.constant 0 : i32
    return %arg1, %c0_i32 : i32, i32
  }
  func.func @transform_3(%arg0: i32, %arg1: i32, %arg2: i32) -> (i32, i32) {
    %c0_i32 = arith.constant 0 : i32
    %c0_i32_0 = arith.constant 0 : i32
    return %arg1, %c0_i32 : i32, i32
  }
  func.func @transform_4(%arg0: i32, %arg1: i32, %arg2: i32) -> (i32, i32, i32) {
    %c0_i32 = arith.constant 0 : i32
    return %arg0, %arg1, %arg2 : i32, i32, i32
  }
}

</mosaic_0001>

<bundles_post_ra>
// kernel: tpu_custom_call.1
= control target key start
LH: loop header
LB: loop body
LE: loop exit
PB: predicated region body
PF: predicated region fallthrough
CT: control target
= control target key end

     0   :  { %9 = vsyncpa [#allocation3], 0  ;;  %s1115_s0 = inlined_call_operand.hbm [shape: f32[2,4,256], index: 0, kind: input, shape index: {}]   ;;  %s1116_s1 = inlined_call_operand.hbm [shape: f32[2,4,256], index: 1, kind: input, shape index: {}]   ;;  %s1117_s2 = inlined_call_operand.vmem [shape: f32[8,12], index: 2, kind: input, shape index: {}]   ;;  %s1118_s3 = inlined_call_operand.vmem [shape: f32[8,1], index: 3, kind: input, shape index: {}]   ;;  %s1119_s4 = inlined_call_operand.hbm [shape: f32[2,8,128], index: 4, kind: output, shape index: {}]  }
   0x1   :  { %11 = vsyncpa [#allocation3 + $0x1], 0 }
   0x2   :  { %12 = vsyncpa [#allocation6], 0 }
   0x3   :  { %14 = vsyncpa [#allocation6 + $0x1], 0 }
   0x4   :  { %15 = vsyncpa [#allocation4], 0 }
   0x5   :  { %17 = vsyncpa [#allocation4 + $0x1], 0  ;;  %s889_s15 = smov 0   ;;  %s891_s16 = smov 0  }
   0x6   :  { %s893_s17 = smov 0   ;;  %s895_s18 = smov 0  }
   0x7   :  { %s897_s19 = smov 0   ;;  %s899_s20 = smov 0  }
   0x8 LB: > { %s581_s21 = sadd.s32 4294967295, %s852_s20   ;;  %s582_s22 = sadd.s32 4294967294, %s852_s20   ;;  %s852_s20 = sphi %s899_s20, %s23_s20   ;;  %s848_s19 = sphi %s897_s19, %s1139_s19   ;;  %s844_s18 = sphi %s895_s18, %s1138_s18   ;;  %s840_s17 = sphi %s893_s17, %s1137_s17   ;;  %s836_s16 = sphi %s891_s16, %s1136_s16   ;;  %s832_s15 = sphi %s889_s15, %s1135_s15  }
   0x9   : > { %s42_s23 = sadd.s32 1, %s848_s19  ;;  %s51_s24 = sadd.s32 1, %s840_s17 }
   0xa   : > { %p44_p0 = scmp.ge.s32.totalorder %s42_s23, 2  ;;  %p58_p1 = scmp.ne.s32.totalorder %s840_s17, %s836_s16 }
   0xb   : > { %p59_p2 = scmp.eq.s32.totalorder %s852_s20, 0  ;;  %p64_p3 = scmp.ne.s32.totalorder %s836_s16, %s832_s15 }
   0xc   : > { %s1141_s23 = smov (%p44_p0, %s42_s23), 0  ;;  %p65_p5 = scmp.eq.s32.totalorder %s581_s21, 0 }
   0xd   : > { %p930_p4 = por %p59_p2, %p58_p1  ;;  %s46_s26 = ssub.s32 %s848_s19, %s1141_s23 }
   0xe   : > { %p174_p6 = scmp.eq.s32.totalorder %s581_s21, 1  ;;  %p49_p7 = scmp.eq.s32.totalorder %s46_s26, 0 }
   0xf   : > { %p936_p8 = por %p65_p5, %p64_p3  ;;  %p180_p10 = scmp.eq.s32.totalorder %s582_s22, 1 }
  0x10   : > { %p940_p9 = por %p174_p6, %p58_p1  ;;  %p636_p13 = scmp.lt.s32.totalorder %s852_s20, 2 }
  0x11   : > { %s1123_s27 = scalar_select %p936_p8, 1, 0 }
  0x12   : > { %s1124_s28 = scalar_select %p940_p9, 1, 0 }
  0x13   : > { %s945_s29 = scalar_select %p49_p7, %s840_s17, %s51_s24  }
  0x14   : > { %p947_p11 = por %p180_p10, %p64_p3  ;;  %s954_s5 = sand.u32 1, %s840_s17  }
  0x15   : > { %s587_s6 = sshll.u32 %s954_s5, 2  ;;  %s603_s7 = sshll.u32 %s848_s19, 7 }
  0x16   : > { %s1125_s30 = scalar_select %p947_p11, 1, 0 }
  0x17   : > { %s963_s10 = scalar_lea.hbm %s1115_s0, %s603_s7  ;;  %s218_s11 = scalar_lea.vmem [#allocation2], %s587_s6 }
  0x18   : > { %s227_s12 = sshll.u32 %s218_s11, 4  ;;  %p971_p0 = pnand %p636_p13, %p930_p4  ;;  %s967_s12 = int_to_ptr.vmem [resolvable:$true] %s227_s12 }
  0x19   : > { %s215_s14 = scalar_lea.sflag [#allocation3], %s954_s5  ;;  %s705_s21 = scalar_lea.hbm %s963_s10, 64 }
  0x1a   : > { %p706_p3 = scmp.ne.s32.totalorder %s963_s10, %s705_s21  ;;  %p707_p5 = pneg %p971_p0 }
  0x1b   : > { %s710_s25 = scalar_lea.hbm %s1115_s0, 256  ;;  %p711_p4 = scmp.lt.u32.totalorder %s963_s10, %s1115_s0 }
  0x1c   : > { %p708_p6 = pnand %p707_p5, %p706_p3  ;;  %p712_p10 = scmp.lt.u32.totalorder %s710_s25, %s705_s21 }
  0x1d   : > { %p714_p12 = scmp.lt.u32.totalorder %s705_s21, %s963_s10 }
  0x1e   : > { %p709_p7 = pneg %p708_p6  ;;  %p713_p13 = por %p712_p10, %p711_p4 }
  0x20   : > { %p715_p1 = por %p714_p12, %p713_p13 }
  0x22   : > { %p716_p2 = pnand %p715_p1, %p709_p7 }
  0x24   : > { %719 = shalt.err (!%p716_p2)
}
  0x25   : > { %s720_s9 = scalar_lea.vmem %s967_s12, 64  ;;  %s854_s11 = smov [#allocation2]  }
  0x26   : > { %p721_p3 = scmp.ne.s32.totalorder %s967_s12, %s720_s9  ;;  %s725_s22 = sshll.u32 %s854_s11, 4  ;;  %s726_s22 = int_to_ptr.vmem [resolvable:$false] %s725_s22 }
  0x27   : > { %s727_s24 = scalar_lea.vmem %s726_s22, 128  ;;  %p728_p9 = scmp.lt.s32.totalorder %s967_s12, %s726_s22 }
  0x28   : > { %p723_p6 = pnand %p721_p3, %p707_p5  ;;  %p729_p4 = scmp.lt.s32.totalorder %s727_s24, %s720_s9 }
  0x2a   : > { %p724_p11 = pneg %p723_p6  ;;  %p730_p10 = por %p729_p4, %p728_p9 }
  0x2c   : > { %p731_p12 = pnand %p730_p10, %p724_p11 }
  0x2e   : > { %734 = shalt.err (!%p731_p12)
}
  0x2f   : > { %628 = dma.hbm_to_vmem [thread:$0]  (!%p971_p0), %s963_s10, 64, %s967_s12, %s215_s14  }
  0x30   : > { %p1127_p1 = scmp.lt.s32.totalorder %s852_s20, 3  ;;  %p1128_p2 = scmp.ge.s32.totalorder %s852_s20, 1 }
  0x31   : > { %s484_s8 = scalar_lea.hbm %s1116_s1, %s603_s7  ;;  %s238_s9 = scalar_lea.vmem [#allocation5], %s587_s6 }
  0x32   : > { %p1007_p7 = pnand %p1128_p2, %p1127_p1  ;;  %s248_s11 = sshll.u32 %s238_s9, 4  ;;  %s249_s11 = int_to_ptr.vmem [resolvable:$true] %s248_s11 }
  0x33   : > { %s1018_s22 = scalar_lea.hbm %s484_s8, 64  ;;  %s235_s10 = scalar_lea.sflag [#allocation6], %s954_s5 }
  0x34   : > { %s1129_s21 = scalar_select %p1007_p7, 1, 0 }
  0x35   : > { %s765_s12 = scalar_lea.hbm %s484_s8, 128  ;;  %s740_s7 = scalar_lea.hbm %s1116_s1, 256 }
  0x36   : > { %p736_p9 = scmp.ne.s32.totalorder %s1018_s22, %s765_s12  ;;  %p741_p3 = scmp.lt.u32.totalorder %s1018_s22, %s1116_s1 }
  0x37   : > { %p742_p6 = scmp.lt.u32.totalorder %s740_s7, %s765_s12  ;;  %p744_p10 = scmp.lt.u32.totalorder %s765_s12, %s1018_s22 }
  0x38   : > { %p738_p11 = pnand %p736_p9, %p707_p5 }
  0x39   : > { %p743_p4 = por %p742_p6, %p741_p3 }
  0x3a   : > { %p739_p13 = pneg %p738_p11 }
  0x3b   : > { %p745_p12 = por %p744_p10, %p743_p4 }
  0x3d   : > { %p746_p1 = pnand %p745_p12, %p739_p13 }
  0x3f   : > { %749 = shalt.err (!%p746_p1)
}
  0x40   : > { %s750_s5 = scalar_lea.vmem %s249_s11, 64  ;;  %s855_s26 = smov [#allocation5]  }
  0x41   : > { %p751_p2 = scmp.ne.s32.totalorder %s249_s11, %s750_s5  ;;  %s755_s8 = sshll.u32 %s855_s26, 4  ;;  %s756_s8 = int_to_ptr.vmem [resolvable:$false] %s755_s8 }
  0x42   : > { %s757_s9 = scalar_lea.vmem %s756_s8, 128  ;;  %p758_p8 = scmp.lt.s32.totalorder %s249_s11, %s756_s8 }
  0x43   : > { %p753_p9 = pnand %p751_p2, %p707_p5  ;;  %p759_p7 = scmp.lt.s32.totalorder %s757_s9, %s750_s5 }
  0x45   : > { %p754_p11 = pneg %p753_p9  ;;  %p760_p3 = por %p759_p7, %p758_p8 }
  0x47   : > { %p761_p6 = pnand %p760_p3, %p754_p11 }
  0x49   : > { %764 = shalt.err (!%p761_p6)
}
  0x4a   : > { %631 = dma.hbm_to_vmem [thread:$0]  (!%p971_p0), %s1018_s22, 64, %s249_s11, %s235_s10  }
  0x4b   : > { %p1130_p13 = scmp.ne.s32.totalorder %s1129_s21, 0 }
  0x4c   : > { %s1042_s12 = sand.u32 (!%p1130_p13), 1, %s836_s16   ;;  %p1131_p5 = scmp.ne.s32.totalorder (!%p1130_p13), %s1123_s27, 0 }
  0x4d   : > { %257 = sbr.rel (%p1130_p13) target bundleno = 447 (0x1bf), region = 36  ;;  %s594_s14 = sshll.u32 (!%p1130_p13), %s1042_s12, 2 }
  0x4e   : > { %s260_s24 = scalar_lea.sflag (!%p1130_p13), [#allocation3], %s1042_s12  ;;  %s263_s7 = scalar_lea.vmem (!%p1130_p13), [#allocation2], %s594_s14 }
  0x54   : > { %819 = dma.done.wait (%p1131_p5), %s260_s24, 64  }
  0x55   : > { %821 = vsyncadd (%p1131_p5), %s260_s24, 4294967232  ;;  %s269_s13 = scalar_lea.sflag [#allocation6], %s1042_s12  ;;  %s272_s11 = scalar_lea.vmem [#allocation5], %s594_s14 }
  0x56   : > { %823 = dma.done.wait (%p1131_p5), %s269_s13, 64  }
  0x57   : > { %825 = vsyncadd (%p1131_p5), %s269_s13, 4294967232  ;;  %v856_v0 = vmov 0.0|0.0   ;;  %v319_v1 = vld [vmem:[%s263_s7] sm:$0xf]  ;;  %v320_v2 = vld [vmem:[%s272_s11] sm:$0xf] }
  0x58   : > { %615 = vmatprep.subr.bf16.mxu0 %v856_v0  ;;  %v323_v3 = vrot.slane %v319_v1, 4  ;;  %v324_v4 = vrot.slane %v320_v2, 4  ;;  %vm857_vm0 = vmmov 0   ;;  %v858_v6 = vmov 0.0   ;;  %v341_v7 = vld [vmem:[%s1118_s3] sm:$0xff]  ;;  %s859_s10 = smov 127  }
  0x59   : > { %612 = vmatprep.mubr.msk.f32.mxu0 %vm857_vm0, %v858_v6  ;;  %v698_v8 = vpack.i.bf16 %v320_v2, %v319_v1  ;;  %v860_v9 = vmov 0   ;;  %s861_s27 = smov 126   ;;  %vm329_vm1 = vcmask 1039360   ;;  %vm336_vm2 = vcmask 1031168   ;;  %v340_v20 = vld [vmem:[%s1117_s2] sm:$0xff]  ;;  %s596_s5 = sshll.u32 %s1042_s12, 3 }
  0x5a   : > { %v693_v5 = vpack.i.bf16 %v324_v4, %v323_v3  ;;  %703 = vset.pattern.permute.xlu1 %v860_v9  ;;  %704 = vset.pattern.permute.xlu0 %v860_v9  ;;  %vm338_vm3 = vcmask 1043456   ;;  %vm862_vm4 = vmmov 1   ;;  %vm347_vm6 = vcmask 97280   ;;  %s600_s26 = sshll.u32 %s844_s18, 7  ;;  %s309_s8 = scalar_lea.vmem [#allocation7], %s596_s5 }
  0x5b   : > { %344 = vperm.xlu1 %703, %v341_v7   ;;  %vm617_vm5 = vmpackc.low %vm338_vm3, %vm862_vm4  ;;  %s440_s9 = sshll.u32 %s309_s8, 4  ;;  %s1066_s7 = scalar_lea.hbm %s1119_s4, %s600_s26  ;;  %s1068_s9 = int_to_ptr.vmem [resolvable:$true] %s440_s9 }
  0x5c   : > { %694 = vrot.lane.b32.xlu0 %v693_v5, %s859_s10  ;;  %s425_s13 = scalar_lea.sflag [#allocation4], %s1042_s12  ;;  %s766_s11 = scalar_lea.vmem %s1068_s9, 128 }
  0x5d   : > { %p767_p8 = scmp.ne.s32.totalorder %s1068_s9, %s766_s11  ;;  %p1132_p0 = scmp.ne.s32.totalorder %s1124_s28, 0 }
  0x5e   : > { %s863_s18 = smov [#allocation7]  }
  0x5f   : > { %p768_p7 = pnand %p767_p8, %p1132_p0  ;;  %s770_s21 = sshll.u32 %s863_s18, 4  ;;  %s771_s21 = int_to_ptr.vmem [resolvable:$false] %s770_s21 }
  0x60   : > { %699 = vrot.lane.b32.xlu0 %v698_v8, %s861_s27  ;;  %s772_s22 = scalar_lea.vmem %s771_s21, 256  ;;  %p773_p10 = scmp.lt.s32.totalorder %s1068_s9, %s771_s21 }
  0x61   : > { %p769_p4 = pneg %p768_p7  ;;  %p774_p12 = scmp.lt.s32.totalorder %s772_s22, %s766_s11 }
  0x63   : > { %p775_p1 = por %p774_p12, %p773_p10 }
  0x65   : > { %p776_p2 = pnand %p775_p1, %p769_p4 }
  0xce   : > { %v695_v10 = vpop.permute.xlu0 %694 }
  0xcf   : > { %v697_v11 = vunpack.i.h.bf16 %v695_v10  ;;  %v696_v12 = vunpack.i.l.bf16 %v695_v10 }
  0xd1   : > { %v330_v13 = vsel %vm329_vm1, %v696_v12, %v697_v11 }
  0xd2   : > { %v700_v14 = vpop.permute.xlu0 %699  ;;  %v339_v18 = vsel %vm338_vm3, %v319_v1, %v330_v13 }
  0xd3   : > { %v702_v15 = vunpack.i.h.bf16 %v700_v14  ;;  %v701_v16 = vunpack.i.l.bf16 %v700_v14 }
  0xd5   : > { %v337_v17 = vsel %vm336_vm2, %v701_v16, %v702_v15 }
  0xd6   : > { %v616_v19 = vpack.c.bf16 %v337_v17, %v339_v18 }
  0xd8   : > { %618 = vmatpush3.bf16.msk.msra.mxu0 %vm617_vm5, %v616_v19 }
  0xda   : > { %v345_v21 = vpop.permute.xlu1 %344 }
  0xdb   : > { %613 = vmatmul.mubr.msk.f32.vlgmr.msra.gmra.mrb[0].mxu0 %vm347_vm6, %v340_v20 }
 0x1ae   : > { %v419_v22 = vpop.f32.mrb[0].mxu0 }
 0x1af   : > { %v420_v23 = vadd.f32 %v419_v22, %v345_v21  ;;  %v614_v24 = vpop.f32.mrb[1].mxu0 }
 0x1b1   : > { %423 = vst [vmem:[%s309_s8] sm:$0xff] %v420_v23 }
 0x1b2   : > { %779 = shalt.err (!%p776_p2)
}
 0x1b3   : > { %s780_s12 = scalar_lea.hbm %s1066_s7, 128  ;;  %s784_s25 = scalar_lea.hbm %s1119_s4, 256 }
 0x1b4   : > { %p781_p9 = scmp.ne.s32.totalorder %s1066_s7, %s780_s12  ;;  %p785_p6 = scmp.lt.u32.totalorder %s1066_s7, %s1119_s4 }
 0x1b5   : > { %p786_p13 = scmp.lt.u32.totalorder %s784_s25, %s780_s12  ;;  %p788_p8 = scmp.lt.u32.totalorder %s780_s12, %s1066_s7 }
 0x1b6   : > { %p782_p11 = pnand %p781_p9, %p1132_p0 }
 0x1b7   : > { %p787_p5 = por %p786_p13, %p785_p6 }
 0x1b8   : > { %p783_p3 = pneg %p782_p11 }
 0x1b9   : > { %p789_p7 = por %p788_p8, %p787_p5 }
 0x1bb   : > { %p790_p4 = pnand %p789_p7, %p783_p3 }
 0x1bd   : > { %793 = shalt.err (!%p790_p4)
}
 0x1be   : > { %623 = dma.vmem_to_hbm [thread:$0]  (%p1132_p0), %s1068_s9, 128, %s1066_s7, %s425_s13  }
 0x1bf PF: > { %s452_s26 = sand.u32 1, %s832_s15   ;;  %p1133_p10 = scmp.ne.s32.totalorder %s1125_s30, 0 }
 0x1c0   : > { %p1134_p12 = scmp.ge.s32.totalorder %s852_s20, 2  ;;  %s453_s8 = scalar_lea.sflag [#allocation4], %s452_s26 }
 0x1c2   : > { %p633_p1 = pnand %p1134_p12, %p1133_p10 }
 0x1c4   : > { %827 = dma.done.wait (!%p633_p1), %s453_s8, 128  }
 0x1c5   : > { %829 = vsyncadd (!%p633_p1), %s453_s8, 4294967168  ;;  %s23_s20 = sadd.s32 1, %s852_s20   ;;  %s1135_s15 = smov %s836_s16 }
 0x1c6   : > { %p20_p2 = scmp.ge.s32.totalorder %s23_s20, 4   ;;  %s1136_s16 = smov %s840_s17 }
 0x1c7   : > { %s1137_s17 = smov %s945_s29  ;;  %s1138_s18 = smov %s848_s19 }
 0x1c8   : > { %s1139_s19 = smov %s1141_s23  ;;  %22 = sbr.rel (!%p20_p2) target bundleno = 8 (0x8), region = 100 }
 0x1cf   :  { %458 = vsyncpa [#allocation3], 1 }
 0x1d0   :  { %460 = vsyncpa [#allocation3 + $0x1], 1 }
 0x1d1   :  { %461 = vsyncpa [#allocation6], 1 }
 0x1d2   :  { %463 = vsyncpa [#allocation6 + $0x1], 1 }
 0x1d3   :  { %464 = vsyncpa [#allocation4], 1 }
 0x1d4   :  { %466 = vsyncpa [#allocation4 + $0x1], 1 }

// kernel: tpu_custom_call.1
= control target key start
LH: loop header
LB: loop body
LE: loop exit
PB: predicated region body
PF: predicated region fallthrough
CT: control target
= control target key end

     0   :  { %9 = vsyncpa [#allocation3], 0  ;;  %s1115_s0 = inlined_call_operand.hbm [shape: f32[2,4,256], index: 0, kind: input, shape index: {}]   ;;  %s1116_s1 = inlined_call_operand.hbm [shape: f32[2,4,256], index: 1, kind: input, shape index: {}]   ;;  %s1117_s2 = inlined_call_operand.vmem [shape: f32[8,12], index: 2, kind: input, shape index: {}]   ;;  %s1118_s3 = inlined_call_operand.vmem [shape: f32[8,1], index: 3, kind: input, shape index: {}]   ;;  %s1119_s4 = inlined_call_operand.hbm [shape: f32[2,8,128], index: 4, kind: output, shape index: {}]  }
   0x1   :  { %11 = vsyncpa [#allocation3 + $0x1], 0 }
   0x2   :  { %12 = vsyncpa [#allocation6], 0 }
   0x3   :  { %14 = vsyncpa [#allocation6 + $0x1], 0 }
   0x4   :  { %15 = vsyncpa [#allocation4], 0 }
   0x5   :  { %17 = vsyncpa [#allocation4 + $0x1], 0  ;;  %s889_s15 = smov 0   ;;  %s891_s16 = smov 0  }
   0x6   :  { %s893_s17 = smov 0   ;;  %s895_s18 = smov 0  }
   0x7   :  { %s897_s19 = smov 0   ;;  %s899_s20 = smov 0  }
   0x8 LB: > { %s581_s21 = sadd.s32 4294967295, %s852_s20   ;;  %s582_s22 = sadd.s32 4294967294, %s852_s20   ;;  %s852_s20 = sphi %s899_s20, %s23_s20   ;;  %s848_s19 = sphi %s897_s19, %s1139_s19   ;;  %s844_s18 = sphi %s895_s18, %s1138_s18   ;;  %s840_s17 = sphi %s893_s17, %s1137_s17   ;;  %s836_s16 = sphi %s891_s16, %s1136_s16   ;;  %s832_s15 = sphi %s889_s15, %s1135_s15  }
   0x9   : > { %s42_s23 = sadd.s32 1, %s848_s19  ;;  %s51_s24 = sadd.s32 1, %s840_s17 }
   0xa   : > { %p44_p0 = scmp.ge.s32.totalorder %s42_s23, 2  ;;  %p58_p1 = scmp.ne.s32.totalorder %s840_s17, %s836_s16 }
   0xb   : > { %p59_p2 = scmp.eq.s32.totalorder %s852_s20, 0  ;;  %p64_p3 = scmp.ne.s32.totalorder %s836_s16, %s832_s15 }
   0xc   : > { %s1141_s23 = smov (%p44_p0, %s42_s23), 0  ;;  %p65_p5 = scmp.eq.s32.totalorder %s581_s21, 0 }
   0xd   : > { %p930_p4 = por %p59_p2, %p58_p1  ;;  %s46_s26 = ssub.s32 %s848_s19, %s1141_s23 }
   0xe   : > { %p174_p6 = scmp.eq.s32.totalorder %s581_s21, 1  ;;  %p49_p7 = scmp.eq.s32.totalorder %s46_s26, 0 }
   0xf   : > { %p936_p8 = por %p65_p5, %p64_p3  ;;  %p180_p10 = scmp.eq.s32.totalorder %s582_s22, 1 }
  0x10   : > { %p940_p9 = por %p174_p6, %p58_p1  ;;  %p636_p13 = scmp.lt.s32.totalorder %s852_s20, 2 }
  0x11   : > { %s1123_s27 = scalar_select %p936_p8, 1, 0 }
  0x12   : > { %s1124_s28 = scalar_select %p940_p9, 1, 0 }
  0x13   : > { %s945_s29 = scalar_select %p49_p7, %s840_s17, %s51_s24  }
  0x14   : > { %p947_p11 = por %p180_p10, %p64_p3  ;;  %s954_s5 = sand.u32 1, %s840_s17  }
  0x15   : > { %s587_s6 = sshll.u32 %s954_s5, 2  ;;  %s603_s7 = sshll.u32 %s848_s19, 7 }
  0x16   : > { %s1125_s30 = scalar_select %p947_p11, 1, 0 }
  0x17   : > { %s963_s10 = scalar_lea.hbm %s1115_s0, %s603_s7  ;;  %s218_s11 = scalar_lea.vmem [#allocation2], %s587_s6 }
  0x18   : > { %s227_s12 = sshll.u32 %s218_s11, 4  ;;  %p971_p0 = pnand %p636_p13, %p930_p4  ;;  %s967_s12 = int_to_ptr.vmem [resolvable:$true] %s227_s12 }
  0x19   : > { %s215_s14 = scalar_lea.sflag [#allocation3], %s954_s5  ;;  %s705_s21 = scalar_lea.hbm %s963_s10, 64 }
  0x1a   : > { %p706_p3 = scmp.ne.s32.totalorder %s963_s10, %s705_s21  ;;  %p707_p5 = pneg %p971_p0 }
  0x1b   : > { %s710_s25 = scalar_lea.hbm %s1115_s0, 256  ;;  %p711_p4 = scmp.lt.u32.totalorder %s963_s10, %s1115_s0 }
  0x1c   : > { %p708_p6 = pnand %p707_p5, %p706_p3  ;;  %p712_p10 = scmp.lt.u32.totalorder %s710_s25, %s705_s21 }
  0x1d   : > { %p714_p12 = scmp.lt.u32.totalorder %s705_s21, %s963_s10 }
  0x1e   : > { %p709_p7 = pneg %p708_p6  ;;  %p713_p13 = por %p712_p10, %p711_p4 }
  0x20   : > { %p715_p1 = por %p714_p12, %p713_p13 }
  0x22   : > { %p716_p2 = pnand %p715_p1, %p709_p7 }
  0x24   : > { %719 = shalt.err (!%p716_p2)
}
  0x25   : > { %s720_s9 = scalar_lea.vmem %s967_s12, 64  ;;  %s854_s11 = smov [#allocation2]  }
  0x26   : > { %p721_p3 = scmp.ne.s32.totalorder %s967_s12, %s720_s9  ;;  %s725_s22 = sshll.u32 %s854_s11, 4  ;;  %s726_s22 = int_to_ptr.vmem [resolvable:$false] %s725_s22 }
  0x27   : > { %s727_s24 = scalar_lea.vmem %s726_s22, 128  ;;  %p728_p9 = scmp.lt.s32.totalorder %s967_s12, %s726_s22 }
  0x28   : > { %p723_p6 = pnand %p721_p3, %p707_p5  ;;  %p729_p4 = scmp.lt.s32.totalorder %s727_s24, %s720_s9 }
  0x2a   : > { %p724_p11 = pneg %p723_p6  ;;  %p730_p10 = por %p729_p4, %p728_p9 }
  0x2c   : > { %p731_p12 = pnand %p730_p10, %p724_p11 }
  0x2e   : > { %734 = shalt.err (!%p731_p12)
}
  0x2f   : > { %628 = dma.hbm_to_vmem [thread:$0]  (!%p971_p0), %s963_s10, 64, %s967_s12, %s215_s14  }
  0x30   : > { %p1127_p1 = scmp.lt.s32.totalorder %s852_s20, 3  ;;  %p1128_p2 = scmp.ge.s32.totalorder %s852_s20, 1 }
  0x31   : > { %s484_s8 = scalar_lea.hbm %s1116_s1, %s603_s7  ;;  %s238_s9 = scalar_lea.vmem [#allocation5], %s587_s6 }
  0x32   : > { %p1007_p7 = pnand %p1128_p2, %p1127_p1  ;;  %s248_s11 = sshll.u32 %s238_s9, 4  ;;  %s249_s11 = int_to_ptr.vmem [resolvable:$true] %s248_s11 }
  0x33   : > { %s1018_s22 = scalar_lea.hbm %s484_s8, 64  ;;  %s235_s10 = scalar_lea.sflag [#allocation6], %s954_s5 }
  0x34   : > { %s1129_s21 = scalar_select %p1007_p7, 1, 0 }
  0x35   : > { %s765_s12 = scalar_lea.hbm %s484_s8, 128  ;;  %s740_s7 = scalar_lea.hbm %s1116_s1, 256 }
  0x36   : > { %p736_p9 = scmp.ne.s32.totalorder %s1018_s22, %s765_s12  ;;  %p741_p3 = scmp.lt.u32.totalorder %s1018_s22, %s1116_s1 }
  0x37   : > { %p742_p6 = scmp.lt.u32.totalorder %s740_s7, %s765_s12  ;;  %p744_p10 = scmp.lt.u32.totalorder %s765_s12, %s1018_s22 }
  0x38   : > { %p738_p11 = pnand %p736_p9, %p707_p5 }
  0x39   : > { %p743_p4 = por %p742_p6, %p741_p3 }
  0x3a   : > { %p739_p13 = pneg %p738_p11 }
  0x3b   : > { %p745_p12 = por %p744_p10, %p743_p4 }
  0x3d   : > { %p746_p1 = pnand %p745_p12, %p739_p13 }
  0x3f   : > { %749 = shalt.err (!%p746_p1)
}
  0x40   : > { %s750_s5 = scalar_lea.vmem %s249_s11, 64  ;;  %s855_s26 = smov [#allocation5]  }
  0x41   : > { %p751_p2 = scmp.ne.s32.totalorder %s249_s11, %s750_s5  ;;  %s755_s8 = sshll.u32 %s855_s26, 4  ;;  %s756_s8 = int_to_ptr.vmem [resolvable:$false] %s755_s8 }
  0x42   : > { %s757_s9 = scalar_lea.vmem %s756_s8, 128  ;;  %p758_p8 = scmp.lt.s32.totalorder %s249_s11, %s756_s8 }
  0x43   : > { %p753_p9 = pnand %p751_p2, %p707_p5  ;;  %p759_p7 = scmp.lt.s32.totalorder %s757_s9, %s750_s5 }
  0x45   : > { %p754_p11 = pneg %p753_p9  ;;  %p760_p3 = por %p759_p7, %p758_p8 }
  0x47   : > { %p761_p6 = pnand %p760_p3, %p754_p11 }
  0x49   : > { %764 = shalt.err (!%p761_p6)
}
  0x4a   : > { %631 = dma.hbm_to_vmem [thread:$0]  (!%p971_p0), %s1018_s22, 64, %s249_s11, %s235_s10  }
  0x4b   : > { %p1130_p13 = scmp.ne.s32.totalorder %s1129_s21, 0 }
  0x4c   : > { %s1042_s12 = sand.u32 (!%p1130_p13), 1, %s836_s16   ;;  %p1131_p5 = scmp.ne.s32.totalorder (!%p1130_p13), %s1123_s27, 0 }
  0x4d   : > { %257 = sbr.rel (%p1130_p13) target bundleno = 447 (0x1bf), region = 36  ;;  %s594_s14 = sshll.u32 (!%p1130_p13), %s1042_s12, 2 }
  0x4e   : > { %s260_s24 = scalar_lea.sflag (!%p1130_p13), [#allocation3], %s1042_s12  ;;  %s263_s7 = scalar_lea.vmem (!%p1130_p13), [#allocation2], %s594_s14 }
  0x54   : > { %819 = dma.done.wait (%p1131_p5), %s260_s24, 64  }
  0x55   : > { %821 = vsyncadd (%p1131_p5), %s260_s24, 4294967232  ;;  %s269_s13 = scalar_lea.sflag [#allocation6], %s1042_s12  ;;  %s272_s11 = scalar_lea.vmem [#allocation5], %s594_s14 }
  0x56   : > { %823 = dma.done.wait (%p1131_p5), %s269_s13, 64  }
  0x57   : > { %825 = vsyncadd (%p1131_p5), %s269_s13, 4294967232  ;;  %v856_v0 = vmov 0.0|0.0   ;;  %v319_v1 = vld [vmem:[%s263_s7] sm:$0xf]  ;;  %v320_v2 = vld [vmem:[%s272_s11] sm:$0xf] }
  0x58   : > { %615 = vmatprep.subr.bf16.mxu0 %v856_v0  ;;  %v323_v3 = vrot.slane %v319_v1, 4  ;;  %v324_v4 = vrot.slane %v320_v2, 4  ;;  %vm857_vm0 = vmmov 0   ;;  %v858_v6 = vmov 0.0   ;;  %v341_v7 = vld [vmem:[%s1118_s3] sm:$0xff]  ;;  %s859_s10 = smov 127  }
  0x59   : > { %612 = vmatprep.mubr.msk.f32.mxu0 %vm857_vm0, %v858_v6  ;;  %v698_v8 = vpack.i.bf16 %v320_v2, %v319_v1  ;;  %v860_v9 = vmov 0   ;;  %s861_s27 = smov 126   ;;  %vm329_vm1 = vcmask 1039360   ;;  %vm336_vm2 = vcmask 1031168   ;;  %v340_v20 = vld [vmem:[%s1117_s2] sm:$0xff]  ;;  %s596_s5 = sshll.u32 %s1042_s12, 3 }
  0x5a   : > { %v693_v5 = vpack.i.bf16 %v324_v4, %v323_v3  ;;  %703 = vset.pattern.permute.xlu1 %v860_v9  ;;  %704 = vset.pattern.permute.xlu0 %v860_v9  ;;  %vm338_vm3 = vcmask 1043456   ;;  %vm862_vm4 = vmmov 1   ;;  %vm347_vm6 = vcmask 97280   ;;  %s600_s26 = sshll.u32 %s844_s18, 7  ;;  %s309_s8 = scalar_lea.vmem [#allocation7], %s596_s5 }
  0x5b   : > { %344 = vperm.xlu1 %703, %v341_v7   ;;  %vm617_vm5 = vmpackc.low %vm338_vm3, %vm862_vm4  ;;  %s440_s9 = sshll.u32 %s309_s8, 4  ;;  %s1066_s7 = scalar_lea.hbm %s1119_s4, %s600_s26  ;;  %s1068_s9 = int_to_ptr.vmem [resolvable:$true] %s440_s9 }
  0x5c   : > { %694 = vrot.lane.b32.xlu0 %v693_v5, %s859_s10  ;;  %s425_s13 = scalar_lea.sflag [#allocation4], %s1042_s12  ;;  %s766_s11 = scalar_lea.vmem %s1068_s9, 128 }
  0x5d   : > { %p767_p8 = scmp.ne.s32.totalorder %s1068_s9, %s766_s11  ;;  %p1132_p0 = scmp.ne.s32.totalorder %s1124_s28, 0 }
  0x5e   : > { %s863_s18 = smov [#allocation7]  }
  0x5f   : > { %p768_p7 = pnand %p767_p8, %p1132_p0  ;;  %s770_s21 = sshll.u32 %s863_s18, 4  ;;  %s771_s21 = int_to_ptr.vmem [resolvable:$false] %s770_s21 }
  0x60   : > { %699 = vrot.lane.b32.xlu0 %v698_v8, %s861_s27  ;;  %s772_s22 = scalar_lea.vmem %s771_s21, 256  ;;  %p773_p10 = scmp.lt.s32.totalorder %s1068_s9, %s771_s21 }
  0x61   : > { %p769_p4 = pneg %p768_p7  ;;  %p774_p12 = scmp.lt.s32.totalorder %s772_s22, %s766_s11 }
  0x63   : > { %p775_p1 = por %p774_p12, %p773_p10 }
  0x65   : > { %p776_p2 = pnand %p775_p1, %p769_p4 }
  0xce   : > { %v695_v10 = vpop.permute.xlu0 %694 }
  0xcf   : > { %v697_v11 = vunpack.i.h.bf16 %v695_v10  ;;  %v696_v12 = vunpack.i.l.bf16 %v695_v10 }
  0xd1   : > { %v330_v13 = vsel %vm329_vm1, %v696_v12, %v697_v11 }
  0xd2   : > { %v700_v14 = vpop.permute.xlu0 %699  ;;  %v339_v18 = vsel %vm338_vm3, %v319_v1, %v330_v13 }
  0xd3   : > { %v702_v15 = vunpack.i.h.bf16 %v700_v14  ;;  %v701_v16 = vunpack.i.l.bf16 %v700_v14 }
  0xd5   : > { %v337_v17 = vsel %vm336_vm2, %v701_v16, %v702_v15 }
  0xd6   : > { %v616_v19 = vpack.c.bf16 %v337_v17, %v339_v18 }
  0xd8   : > { %618 = vmatpush3.bf16.msk.msra.mxu0 %vm617_vm5, %v616_v19 }
  0xda   : > { %v345_v21 = vpop.permute.xlu1 %344 }
  0xdb   : > { %613 = vmatmul.mubr.msk.f32.vlgmr.msra.gmra.mrb[0].mxu0 %vm347_vm6, %v340_v20 }
 0x1ae   : > { %v419_v22 = vpop.f32.mrb[0].mxu0 }
 0x1af   : > { %v420_v23 = vadd.f32 %v419_v22, %v345_v21  ;;  %v614_v24 = vpop.f32.mrb[1].mxu0 }
 0x1b1   : > { %423 = vst [vmem:[%s309_s8] sm:$0xff] %v420_v23 }
 0x1b2   : > { %779 = shalt.err (!%p776_p2)
}
 0x1b3   : > { %s780_s12 = scalar_lea.hbm %s1066_s7, 128  ;;  %s784_s25 = scalar_lea.hbm %s1119_s4, 256 }
 0x1b4   : > { %p781_p9 = scmp.ne.s32.totalorder %s1066_s7, %s780_s12  ;;  %p785_p6 = scmp.lt.u32.totalorder %s1066_s7, %s1119_s4 }
 0x1b5   : > { %p786_p13 = scmp.lt.u32.totalorder %s784_s25, %s780_s12  ;;  %p788_p8 = scmp.lt.u32.totalorder %s780_s12, %s1066_s7 }
 0x1b6   : > { %p782_p11 = pnand %p781_p9, %p1132_p0 }
 0x1b7   : > { %p787_p5 = por %p786_p13, %p785_p6 }
 0x1b8   : > { %p783_p3 = pneg %p782_p11 }
 0x1b9   : > { %p789_p7 = por %p788_p8, %p787_p5 }
 0x1bb   : > { %p790_p4 = pnand %p789_p7, %p783_p3 }
 0x1bd   : > { %793 = shalt.err (!%p790_p4)
}
 0x1be   : > { %623 = dma.vmem_to_hbm [thread:$0]  (%p1132_p0), %s1068_s9, 128, %s1066_s7, %s425_s13  }
 0x1bf PF: > { %s452_s26 = sand.u32 1, %s832_s15   ;;  %p1133_p10 = scmp.ne.s32.totalorder %s1125_s30, 0 }
 0x1c0   : > { %p1134_p12 = scmp.ge.s32.totalorder %s852_s20, 2  ;;  %s453_s8 = scalar_lea.sflag [#allocation4], %s452_s26 }
 0x1c2   : > { %p633_p1 = pnand %p1134_p12, %p1133_p10 }
 0x1c4   : > { %827 = dma.done.wait (!%p633_p1), %s453_s8, 128  }
 0x1c5   : > { %829 = vsyncadd (!%p633_p1), %s453_s8, 4294967168  ;;  %s23_s20 = sadd.s32 1, %s852_s20   ;;  %s1135_s15 = smov %s836_s16 }
 0x1c6   : > { %p20_p2 = scmp.ge.s32.totalorder %s23_s20, 4   ;;  %s1136_s16 = smov %s840_s17 }
 0x1c7   : > { %s1137_s17 = smov %s945_s29  ;;  %s1138_s18 = smov %s848_s19 }
 0x1c8   : > { %s1139_s19 = smov %s1141_s23  ;;  %22 = sbr.rel (!%p20_p2) target bundleno = 8 (0x8), region = 100 }
 0x1cf   :  { %458 = vsyncpa [#allocation3], 1 }
 0x1d0   :  { %460 = vsyncpa [#allocation3 + $0x1], 1 }
 0x1d1   :  { %461 = vsyncpa [#allocation6], 1 }
 0x1d2   :  { %463 = vsyncpa [#allocation6 + $0x1], 1 }
 0x1d3   :  { %464 = vsyncpa [#allocation4], 1 }
 0x1d4   :  { %466 = vsyncpa [#allocation4 + $0x1], 1 }

</bundles_post_ra>
